<compile_context>
chip_gen: v7x
topology: tpu7x:2x2x1
jax: 0.10.0
libtpu: 0.0.40
codegen_flags: <defaults>
</compile_context>

<pallas_src>
import jax
import jax.numpy as jnp
from jax.experimental import pallas as pl
from jax.experimental.pallas import tpu as pltpu


def mlp_kernel(x_ref, p_ref, o_ref):
    x = x_ref[...]                 # [B, 2]  f32
    w1 = p_ref[0:2, :]             # [2, H]  f32   (static slices of one slab)
    b1 = p_ref[2:3, :]             # [1, H]
    w2t = p_ref[3:4, :]            # [1, H]  (fc2 weight column, lane-dense)
    b2 = p_ref[4:5, :][:, 0:1]     # [1, 1]  (b2 replicated across lanes; take lane 0)

    # fc1 (K=2) on the VPU: two broadcast multiply-adds, skip the MXU.
    h = (x[:, 0:1] * w1[0:1, :]
         + x[:, 1:2] * w1[1:2, :]
         + b1)                                            # [B, H]
    h = jnp.tanh(h)                                       # EUP tanh, f32

    # fc2 (N=1) as VPU multiply + XLU lane reduction (kept in f32).
    y = jnp.sum(h * w2t, axis=-1, keepdims=True)          # [B, 1]

    o_ref[...] = (y + b2).astype(o_ref.dtype)


def pack_params(w1, b1, w2, b2):
    """Pack all static parameters into one [5, H] f32 slab (done ONCE at init).

    rows 0-1: w1 [2, H]; row 2: b1 [1, H]; row 3: w2^T [1, H];
    row 4: b2 broadcast across H (kernel reads lane 0).
    """
    H = w1.shape[1]
    w2t = jnp.reshape(w2, (1, H))
    b2_row = jnp.full((1, H), jnp.reshape(b2, ()), dtype=jnp.float32)
    return jnp.concatenate(
        [w1.astype(jnp.float32), b1.astype(jnp.float32), w2t.astype(jnp.float32), b2_row],
        axis=0,
    )                                                      # [5, H]


def mlp_forward(x, params):
    """x: [B, 2] f32; params: [5, H] f32 packed slab (see pack_params)."""
    B = x.shape[0]
    vmem = pl.BlockSpec(memory_space=pltpu.MemorySpace.VMEM)
    return pl.pallas_call(
        mlp_kernel,
        out_shape=jax.ShapeDtypeStruct((B, 1), jnp.float32),
        in_specs=[vmem, vmem],
        out_specs=vmem,
    )(x, params)


def init_params(key, hidden):
    """Deterministic init matching PyTorch nn.Linear default (U[-1/sqrt(fan_in), +])."""
    k1, k2, k3, k4 = jax.random.split(key, 4)
    bound1 = 1.0 / jnp.sqrt(2.0)
    bound2 = 1.0 / jnp.sqrt(float(hidden))
    w1 = jax.random.uniform(k1, (2, hidden), jnp.float32, -bound1, bound1)
    b1 = jax.random.uniform(k2, (1, hidden), jnp.float32, -bound1, bound1)
    w2 = jax.random.uniform(k3, (hidden, 1), jnp.float32, -bound2, bound2)
    b2 = jax.random.uniform(k4, (1, 1), jnp.float32, -bound2, bound2)
    return w1, b1, w2, b2


if __name__ == "__main__":
    hidden = 32
    batch = 8

    key = jax.random.PRNGKey(0)
    kp, kx = jax.random.split(key)
    w1, b1, w2, b2 = init_params(kp, hidden)

    # Pack parameters ONCE (hoisted out of the per-call path).
    params = pack_params(w1, b1, w2, b2)

    # XOR-style inputs in {-1, +1}, small batch.
    x = jnp.sign(jax.random.normal(kx, (batch, 2), jnp.float32))
    x = jnp.where(x == 0, 1.0, x)

    out = mlp_forward(x, params)
    out = jax.block_until_ready(out)

    # Reference check in plain JAX (same math as the PyTorch module).
    ref = jnp.tanh(x @ w1 + b1) @ w2 + b2
    assert out.shape == (batch, 1)
    assert jnp.allclose(out, ref, atol=1e-5, rtol=1e-5)

    print("KERNEL_OK")
</pallas_src>

<mosaic_0001>
module attributes {stable_mosaic.version = 11 : i64} {
  func.func @mlp_kernel(%arg0: memref<8x2xf32, #tpu.memory_space<vmem>>, %arg1: memref<5x32xf32, #tpu.memory_space<vmem>>, %arg2: memref<8x1xf32, #tpu.memory_space<vmem>>) attributes {dimension_semantics = [], scalar_prefetch = 0 : i64, scratch_operands = 0 : i64, tpu.core_type = #tpu.core_type<tc>} {
    %c0 = arith.constant 0 : index
    %c0_0 = arith.constant 0 : index
    %0 = vector.load %arg0[%c0, %c0_0] : memref<8x2xf32, #tpu.memory_space<vmem>>, vector<8x2xf32>
    %c0_1 = arith.constant 0 : index
    %c0_2 = arith.constant 0 : index
    %1 = vector.load %arg1[%c0_1, %c0_2] : memref<5x32xf32, #tpu.memory_space<vmem>>, vector<2x32xf32>
    %c2 = arith.constant 2 : index
    %c0_3 = arith.constant 0 : index
    %2 = vector.load %arg1[%c2, %c0_3] : memref<5x32xf32, #tpu.memory_space<vmem>>, vector<1x32xf32>
    %c3 = arith.constant 3 : index
    %c0_4 = arith.constant 0 : index
    %3 = vector.load %arg1[%c3, %c0_4] : memref<5x32xf32, #tpu.memory_space<vmem>>, vector<1x32xf32>
    %c4 = arith.constant 4 : index
    %c0_5 = arith.constant 0 : index
    %4 = vector.load %arg1[%c4, %c0_5] : memref<5x32xf32, #tpu.memory_space<vmem>>, vector<1x32xf32>
    %5 = vector.extract_strided_slice %4 {offsets = [0, 0], sizes = [1, 1], strides = [1, 1]} : vector<1x32xf32> to vector<1x1xf32>
    %6 = vector.extract_strided_slice %0 {offsets = [0, 0], sizes = [8, 1], strides = [1, 1]} : vector<8x2xf32> to vector<8x1xf32>
    %7 = vector.extract_strided_slice %1 {offsets = [0, 0], sizes = [1, 32], strides = [1, 1]} : vector<2x32xf32> to vector<1x32xf32>
    %8 = vector.broadcast %6 : vector<8x1xf32> to vector<8x32xf32>
    %9 = vector.broadcast %7 : vector<1x32xf32> to vector<8x32xf32>
    %10 = arith.mulf %8, %9 : vector<8x32xf32>
    %11 = vector.extract_strided_slice %0 {offsets = [0, 1], sizes = [8, 1], strides = [1, 1]} : vector<8x2xf32> to vector<8x1xf32>
    %12 = vector.extract_strided_slice %1 {offsets = [1, 0], sizes = [1, 32], strides = [1, 1]} : vector<2x32xf32> to vector<1x32xf32>
    %13 = vector.broadcast %11 : vector<8x1xf32> to vector<8x32xf32>
    %14 = vector.broadcast %12 : vector<1x32xf32> to vector<8x32xf32>
    %15 = arith.mulf %13, %14 : vector<8x32xf32>
    %16 = arith.addf %10, %15 : vector<8x32xf32>
    %17 = vector.broadcast %2 : vector<1x32xf32> to vector<8x32xf32>
    %18 = arith.addf %16, %17 : vector<8x32xf32>
    %19 = math.tanh %18 : vector<8x32xf32>
    %20 = vector.broadcast %3 : vector<1x32xf32> to vector<8x32xf32>
    %21 = arith.mulf %19, %20 : vector<8x32xf32>
    %cst = arith.constant dense<0.000000e+00> : vector<8xf32>
    %22 = vector.multi_reduction <add>, %21, %cst [1] : vector<8x32xf32> to vector<8xf32>
    %23 = vector.shape_cast %22 : vector<8xf32> to vector<8x1xf32>
    %24 = vector.broadcast %5 : vector<1x1xf32> to vector<8x1xf32>
    %25 = arith.addf %23, %24 : vector<8x1xf32>
    %c0_6 = arith.constant 0 : index
    %c0_7 = arith.constant 0 : index
    %26 = vector.load %arg2[%c0_6, %c0_7] : memref<8x1xf32, #tpu.memory_space<vmem>>, vector<8x1xf32>
    tpu.vector_store %arg2[%c0_6, %c0_7], %25 {strides = array<i32>} : memref<8x1xf32, #tpu.memory_space<vmem>>, vector<8x1xf32>,
    return
  }
}

</mosaic_0001>

<bundles_post_ra>
// kernel: tpu_custom_call.1
= control target key start
LH: loop header
LB: loop body
LE: loop exit
PB: predicated region body
PF: predicated region fallthrough
CT: control target
= control target key end

     0   :  { %v71_v0 = vmov 0   ;;  %v72_v2 = vmov 1   ;;  %v21_v3 = vlaneseq  ;;  %vm47_vm0 = vcmask 261120   ;;  %s106_s0 = inlined_call_operand.vmem [shape: f32[8,2], index: 0, kind: input, shape index: {}]   ;;  %s107_s1 = inlined_call_operand.vmem [shape: f32[5,32], index: 1, kind: input, shape index: {}]   ;;  %s108_s2 = inlined_call_operand.vmem [shape: f32[8,1], index: 2, kind: output, shape index: {}]  }
   0x1   :  { %67 = vset.pattern.permute.xlu0 %v71_v0  ;;  %v11_v1 = vld [vmem:[%s106_s0] sm:$0xff]  ;;  %vm56_vm1 = vcmask 7168  }
   0x2   :  { %18 = vperm.xlu0 %67, %v11_v1   ;;  %v22_v4 = vshrl.u32 %v21_v3, 7  ;;  %v12_v7 = vld [vmem:[%s107_s1] sm:$0x3]  ;;  %v62_v14 = vld [vmem:[%s107_s1 + $0x2] ss:$0 sm:$0xff] }
   0x3   :  { %v63_v17 = vld [vmem:[%s107_s1 + $0x3] ss:$0 sm:$0xff]  ;;  %v64_v21 = vld [vmem:[%s107_s1 + $0x4] ss:$0 sm:$0xff] }
   0x4   :  { %v23_v5 = vsub.s32 0, %v22_v4  ;;  %v32_v6 = vsub.s32 1, %v22_v4 }
   0x6   :  { %68 = vset.pattern.permute.xlu0 %v72_v2  ;;  %v24_v9 = vrot.slane %v12_v7, %v23_v5  ;;  %v33_v10 = vrot.slane %v12_v7, %v32_v6 }
   0x7   :  { %27 = vperm.xlu0 %68, %v11_v1  }
  0x81   :  { %v19_v8 = vpop.permute.xlu0 %18 }
  0x82   :  { %v25_v12 = vmul.f32 %v24_v9, %v19_v8 }
  0x86   :  { %v28_v11 = vpop.permute.xlu0 %27 }
  0x87   :  { %v34_v13 = vmul.f32 %v33_v10, %v28_v11 }
  0x89   :  { %v35_v15 = vadd.f32 %v34_v13, %v25_v12 }
  0x8b   :  { %v40_v16 = vadd.f32 %v62_v14, %v35_v15 }
  0x8d   :  { %69 = vtanh.f32 %v40_v16 }
  0x97   :  { %v70_v18 = vpop.eup %69 }
  0x98   :  { %v46_v19 = vmul.f32 %v70_v18, %v63_v17 }
  0x9a   :  { %v48_v20 = vsel %vm47_vm0, %v46_v19, 0.0 }
  0x9b   :  { %49 = vadd.xlane.f32.xlu1 %v48_v20 }
 0x128   :  { %v50_v22 = vpop.xlane.xlu1 %49 }
 0x129   :  { %v55_v23 = vadd.f32 %v64_v21, %v50_v22 }
 0x12b   :  { %57 = vst.msk [vmem:[%s108_s2] sm:$0xff] %vm56_vm1, %v55_v23 }

</bundles_post_ra>
